<compile_context>
chip_gen: v7x
topology: tpu7x:2x2x1
jax: 0.10.0
libtpu: 0.0.40
codegen_flags: <defaults>
</compile_context>

<pallas_src>
import functools

import numpy as np
import jax
import jax.numpy as jnp
from jax.experimental import pallas as pl
from jax.experimental.pallas import tpu as pltpu

# Matcher weights (module __init__ defaults), fixed deterministically in-script.
COST_CLASS = 1.0
COST_BBOX = 1.0
COST_GIOU = 1.0


def _round_up(x, m):
    return (x + m - 1) // m * m


def _cost_kernel(logits_ref, onehot_t_ref, out_bbox_ref, tgt_bbox_t_ref, c_ref, *,
                 w_class, w_bbox, w_giou):
    # ---- classification cost: softmax numerator + one-hot gather on the MXU ----
    logits = logits_ref[...].astype(jnp.float32)                 # [TN, C]
    m = jnp.max(logits, axis=-1, keepdims=True)
    e = jnp.exp(logits - m)                                      # [TN, C]
    s = jnp.sum(e, axis=-1, keepdims=True)                       # [TN, 1]
    inv_s = pl.reciprocal(s, approx=True)                        # EUP reciprocal

    # bf16 matmul: one-hot is exact in bf16, e loses ~2^-9 relative (fine for a
    # matching cost).  Softmax denominator and the cost_class minus sign are
    # folded into a narrow per-row scale applied after the matmul.
    prob_num = jnp.dot(e.astype(jnp.bfloat16), onehot_t_ref[...],
                       preferred_element_type=jnp.float32)       # [TN, TM]
    cls_scale = inv_s * jnp.float32(-w_class)                    # [TN, 1]

    # ---- box costs: everything stays narrow, implicit broadcasting only ----
    ob = out_bbox_ref[...].astype(jnp.float32)                   # [TN, 4] (cx, cy, w, h)
    tbt = tgt_bbox_t_ref[...].astype(jnp.float32)                # [4, TM]

    ocx = ob[:, 0:1]; ocy = ob[:, 1:2]; ow = ob[:, 2:3]; oh = ob[:, 3:4]      # [TN, 1]
    tcx = tbt[0:1, :]; tcy = tbt[1:2, :]; tw = tbt[2:3, :]; th = tbt[3:4, :]  # [1, TM]

    # L1 cdist over cxcywh coordinates (broadcasts [TN,1] vs [1,TM] per op)
    cost_bbox = (jnp.abs(ocx - tcx) + jnp.abs(ocy - tcy)
                 + jnp.abs(ow - tw) + jnp.abs(oh - th))          # [TN, TM]

    # cxcywh -> xyxy corners, kept narrow; areas come straight from w*h
    ox0 = ocx - 0.5 * ow; oy0 = ocy - 0.5 * oh
    ox1 = ocx + 0.5 * ow; oy1 = ocy + 0.5 * oh
    tx0 = tcx - 0.5 * tw; ty0 = tcy - 0.5 * th
    tx1 = tcx + 0.5 * tw; ty1 = tcy + 0.5 * th
    area1 = ow * oh                                              # [TN, 1]
    area2 = tw * th                                              # [1, TM]

    # pairwise IoU
    lt_x = jnp.maximum(ox0, tx0); lt_y = jnp.maximum(oy0, ty0)   # [TN, TM]
    rb_x = jnp.minimum(ox1, tx1); rb_y = jnp.minimum(oy1, ty1)
    inter = jnp.maximum(rb_x - lt_x, 0.0) * jnp.maximum(rb_y - lt_y, 0.0)
    union = (area1 + area2) - inter                              # [TN, TM]
    iou = inter * pl.reciprocal(union, approx=True)

    # enclosing box for generalized IoU; no clamp needed (erb >= elt for valid
    # boxes, including the non-degenerate dummy padding boxes)
    elt_x = jnp.minimum(ox0, tx0); elt_y = jnp.minimum(oy0, ty0)
    erb_x = jnp.maximum(ox1, tx1); erb_y = jnp.maximum(oy1, ty1)
    enclose = (erb_x - elt_x) * (erb_y - elt_y)
    cost_giou = (enclose - union) * pl.reciprocal(enclose, approx=True) - iou

    # weighted sum; unit weights skip their multiplies (decided at trace time)
    total = prob_num * cls_scale
    total = total + (cost_bbox if w_bbox == 1.0 else jnp.float32(w_bbox) * cost_bbox)
    total = total + (cost_giou if w_giou == 1.0 else jnp.float32(w_giou) * cost_giou)
    c_ref[...] = total


def _pick_tile_m(M_pad):
    for cand in (512, 256):
        if M_pad % cand == 0:
            return cand
    return 128


def _pick_tile_n(N, C, tile_m):
    # at least 2 N-tiles when N > 8 so the parallel grid shards across v7x megacore
    if N <= 512:
        if N > 8:
            tile_n = _round_up(-(-N // 2), 8)
        else:
            tile_n = _round_up(max(N, 1), 8)
    else:
        tile_n = 512

    # conservative VMEM budget (double-buffered ins/outs + ~14 live [TN,TM] temps);
    # keeps the per-step working set well under v7x's 64 MiB physical VMEM.
    def vmem_bytes(tn):
        return (2 * tn * C * 4             # logits tile (f32)
                + 2 * C * tile_m * 2       # bf16 one-hot tile
                + 2 * tn * 4 * 4           # pred box tile
                + 2 * 4 * tile_m * 4       # target box tile
                + 2 * tn * tile_m * 4      # output tile
                + 14 * tn * tile_m * 4)    # live full-width temporaries

    while tile_n > 8 and vmem_bytes(tile_n) > 40 * 2**20:
        tile_n = max(8, _round_up(tile_n // 2, 8))
    return tile_n


def compute_cost_matrix(pred_logits, pred_boxes, tgt_ids, tgt_boxes,
                        w_class=COST_CLASS, w_bbox=COST_BBOX, w_giou=COST_GIOU):
    """Returns the DETR matching cost matrix of shape [B, Q, M] (float32)."""
    B, Q, C = pred_logits.shape
    N = B * Q
    M = int(tgt_ids.shape[0])
    if M == 0:
        # no targets anywhere -> zero-width cost matrix (Pallas can't emit a 0-sized out)
        return jnp.zeros((B, Q, 0), jnp.float32)

    # ---- target padding: lane axis padded to a multiple of 128 (lane-dense out) ----
    M_pad = _round_up(M, 128)
    tile_m = _pick_tile_m(M_pad)

    # ---- prediction tiling: VMEM-budgeted, >= 2 grid steps when N > 8 ----
    tile_n = _pick_tile_n(N, C, tile_m)
    N_pad = _round_up(N, tile_n)

    # class axis is NOT padded: the logits block keeps the full class dim (legal
    # because it equals the array dim) and the MXU handles K = C internally.
    logits = pred_logits.reshape(N, C)
    out_bbox = pred_boxes.reshape(N, 4)
    if N_pad > N:
        logits = jnp.pad(logits, ((0, N_pad - N), (0, 0)))
        # non-degenerate dummy boxes (cx=cy=w=h=0.5) keep padded rows NaN-free
        out_bbox = jnp.pad(out_bbox, ((0, N_pad - N), (0, 0)), constant_values=0.5)

    onehot_t = jax.nn.one_hot(tgt_ids, C, dtype=jnp.bfloat16).T   # [C, M] bf16 (exact)
    tgt_bbox_t = tgt_boxes.astype(jnp.float32).T                  # [4, M]
    if M_pad > M:
        onehot_t = jnp.pad(onehot_t, ((0, 0), (0, M_pad - M)))
        tgt_bbox_t = jnp.pad(tgt_bbox_t, ((0, 0), (0, M_pad - M)), constant_values=0.5)

    grid = (N_pad // tile_n, M_pad // tile_m)
    kernel = functools.partial(_cost_kernel, w_class=float(w_class),
                               w_bbox=float(w_bbox), w_giou=float(w_giou))

    flops = 2.0 * N_pad * C * M_pad + 30.0 * N_pad * M_pad
    transcendentals = N_pad * C + 2.0 * N_pad * M_pad + N_pad
    bytes_accessed = (N_pad * C * logits.dtype.itemsize
                      + C * M_pad * 2
                      + N_pad * 4 * out_bbox.dtype.itemsize
                      + 4 * M_pad * 4
                      + N_pad * M_pad * 4)

    cost = pl.pallas_call(
        kernel,
        out_shape=jax.ShapeDtypeStruct((N_pad, M_pad), jnp.float32),
        grid_spec=pltpu.PrefetchScalarGridSpec(
            num_scalar_prefetch=0,
            grid=grid,
            in_specs=[
                pl.BlockSpec((tile_n, C), lambda i, j: (i, 0)),      # logits tile
                pl.BlockSpec((C, tile_m), lambda i, j: (0, j)),      # bf16 one-hot tile
                pl.BlockSpec((tile_n, 4), lambda i, j: (i, 0)),      # pred boxes tile
                pl.BlockSpec((4, tile_m), lambda i, j: (0, j)),      # tgt boxes tile
            ],
            out_specs=pl.BlockSpec((tile_n, tile_m), lambda i, j: (i, j)),
        ),
        compiler_params=pltpu.CompilerParams(
            dimension_semantics=("parallel", "parallel"),
            vmem_limit_bytes=64 * 1024 * 1024),
        cost_estimate=pl.CostEstimate(flops=int(flops),
                                      transcendentals=int(transcendentals),
                                      bytes_accessed=int(bytes_accessed)),
    )(logits, onehot_t, out_bbox, tgt_bbox_t)

    # slice away row / target padding on the host side
    return cost[:N, :M].reshape(B, Q, M)


# ---------- linear_sum_assignment (Hungarian / Jonker-Volgenant) on host ----------
# TODO(synk): the Hungarian assignment itself is a sequential combinatorial algorithm
# with no clean Pallas equivalent; it runs on host over the kernel-produced cost matrix.
def _linear_sum_assignment_np(cost):
    cost = np.asarray(cost, dtype=np.float64)
    transposed = False
    if cost.shape[0] > cost.shape[1]:
        cost = cost.T
        transposed = True
    n, m = cost.shape
    INF = np.inf
    u = np.zeros(n + 1)
    v = np.zeros(m + 1)
    p = np.zeros(m + 1, dtype=np.int64)
    way = np.zeros(m + 1, dtype=np.int64)
    for i in range(1, n + 1):
        p[0] = i
        j0 = 0
        minv = np.full(m + 1, INF)
        used = np.zeros(m + 1, dtype=bool)
        while True:
            used[j0] = True
            i0 = p[j0]
            delta = INF
            j1 = 0
            for j in range(1, m + 1):
                if not used[j]:
                    cur = cost[i0 - 1, j - 1] - u[i0] - v[j]
                    if cur < minv[j]:
                        minv[j] = cur
                        way[j] = j0
                    if minv[j] < delta:
                        delta = minv[j]
                        j1 = j
            for j in range(m + 1):
                if used[j]:
                    u[p[j]] += delta
                    v[j] -= delta
                else:
                    minv[j] -= delta
            j0 = j1
            if p[j0] == 0:
                break
        while True:
            j1 = way[j0]
            p[j0] = p[j1]
            j0 = j1
            if j0 == 0:
                break
    rows, cols = [], []
    for j in range(1, m + 1):
        if p[j] != 0:
            rows.append(p[j] - 1)
            cols.append(j - 1)
    rows = np.asarray(rows, dtype=np.int64)
    cols = np.asarray(cols, dtype=np.int64)
    if transposed:
        rows, cols = cols, rows
    order = np.argsort(rows, kind="stable")
    return rows[order], cols[order]


try:
    from scipy.optimize import linear_sum_assignment as _lsa  # type: ignore
except Exception:  # pragma: no cover
    _lsa = _linear_sum_assignment_np


class HungarianMatcherPallas:
    """Pallas-backed HungarianMatcher: cost matrix on TPU, assignment on host."""

    def __init__(self, cost_class=1.0, cost_bbox=1.0, cost_giou=1.0):
        assert cost_class != 0 or cost_bbox != 0 or cost_giou != 0
        self.cost_class = cost_class
        self.cost_bbox = cost_bbox
        self.cost_giou = cost_giou

    def __call__(self, outputs, targets):
        pred_logits = outputs["pred_logits"]
        pred_boxes = outputs["pred_boxes"]
        tgt_ids = jnp.concatenate([t["labels"] for t in targets])
        tgt_boxes = jnp.concatenate([t["boxes"] for t in targets])

        C = compute_cost_matrix(pred_logits, pred_boxes, tgt_ids, tgt_boxes,
                                self.cost_class, self.cost_bbox, self.cost_giou)
        C = np.asarray(jax.block_until_ready(C))                 # [B, Q, M]

        sizes = [int(t["boxes"].shape[0]) for t in targets]
        indices = []
        off = 0
        for i, s in enumerate(sizes):
            sub = C[i, :, off:off + s]
            r, c = _lsa(sub)
            indices.append((np.asarray(r, dtype=np.int64),
                            np.asarray(c, dtype=np.int64)))
            off += s
        return indices, C


def _ref_cost_numpy(pred_logits, pred_boxes, tgt_ids, tgt_boxes):
    """Pure NumPy reference of the cost matrix (for validation)."""
    logits = np.asarray(pred_logits, dtype=np.float64).reshape(-1, pred_logits.shape[-1])
    boxes = np.asarray(pred_boxes, dtype=np.float64).reshape(-1, 4)
    tids = np.asarray(tgt_ids)
    tb = np.asarray(tgt_boxes, dtype=np.float64)

    e = np.exp(logits - logits.max(-1, keepdims=True))
    prob = e / e.sum(-1, keepdims=True)
    cost_class = -prob[:, tids]
    cost_bbox = np.abs(boxes[:, None, :] - tb[None, :, :]).sum(-1)

    def to_xyxy(b):
        cx, cy, w, h = b[:, 0], b[:, 1], b[:, 2], b[:, 3]
        return np.stack([cx - 0.5 * w, cy - 0.5 * h, cx + 0.5 * w, cy + 0.5 * h], -1)

    b1, b2 = to_xyxy(boxes), to_xyxy(tb)
    a1 = (b1[:, 2] - b1[:, 0]) * (b1[:, 3] - b1[:, 1])
    a2 = (b2[:, 2] - b2[:, 0]) * (b2[:, 3] - b2[:, 1])
    lt = np.maximum(b1[:, None, :2], b2[None, :, :2])
    rb = np.minimum(b1[:, None, 2:], b2[None, :, 2:])
    wh = np.clip(rb - lt, 0, None)
    inter = wh[:, :, 0] * wh[:, :, 1]
    union = a1[:, None] + a2[None, :] - inter
    iou = inter / union
    lt2 = np.minimum(b1[:, None, :2], b2[None, :, :2])
    rb2 = np.maximum(b1[:, None, 2:], b2[None, :, 2:])
    wh2 = np.clip(rb2 - lt2, 0, None)
    area = wh2[:, :, 0] * wh2[:, :, 1]
    giou = iou - (area - union) / area
    return COST_BBOX * cost_bbox + COST_CLASS * cost_class + COST_GIOU * (-giou)


if __name__ == "__main__":
    B, Q, NUM_CLASSES = 2, 8, 32
    sizes = [3, 5]

    key = jax.random.PRNGKey(0)
    k1, k2, k3, k4, k5, k6 = jax.random.split(key, 6)

    pred_logits = jax.random.normal(k1, (B, Q, NUM_CLASSES), dtype=jnp.float32)
    pred_cxcy = jax.random.uniform(k2, (B, Q, 2), minval=0.25, maxval=0.75)
    pred_wh = jax.random.uniform(k3, (B, Q, 2), minval=0.10, maxval=0.40)
    pred_boxes = jnp.concatenate([pred_cxcy, pred_wh], axis=-1).astype(jnp.float32)

    targets = []
    for i, s in enumerate(sizes):
        kl, kb = jax.random.split(jax.random.fold_in(k4, i))
        labels = jax.random.randint(kl, (s,), 0, NUM_CLASSES, dtype=jnp.int32)
        cxcy = jax.random.uniform(jax.random.fold_in(k5, i), (s, 2), minval=0.25, maxval=0.75)
        wh = jax.random.uniform(jax.random.fold_in(k6, i), (s, 2), minval=0.10, maxval=0.40)
        boxes = jnp.concatenate([cxcy, wh], axis=-1).astype(jnp.float32)
        targets.append({"labels": labels, "boxes": boxes})

    matcher = HungarianMatcherPallas(COST_CLASS, COST_BBOX, COST_GIOU)
    outputs = {"pred_logits": pred_logits, "pred_boxes": pred_boxes}
    indices, C_kernel = matcher(outputs, targets)

    # validate the Pallas cost matrix against a NumPy reference
    # (tolerances loosened for the bf16 gather matmul and approx EUP reciprocals)
    tgt_ids = jnp.concatenate([t["labels"] for t in targets])
    tgt_boxes = jnp.concatenate([t["boxes"] for t in targets])
    C_ref = _ref_cost_numpy(pred_logits, pred_boxes, tgt_ids, tgt_boxes).reshape(B, Q, -1)
    np.testing.assert_allclose(C_kernel, C_ref, rtol=2e-2, atol=2e-2)

    # sanity on assignment output shapes/semantics
    for (idx_i, idx_j), s in zip(indices, sizes):
        assert len(idx_i) == len(idx_j) == min(Q, s)
        assert idx_i.dtype == np.int64 and idx_j.dtype == np.int64

    print("KERNEL_OK")
</pallas_src>

<mosaic_0001>
module attributes {stable_mosaic.version = 11 : i64} {
  func.func @_cost_kernel(%arg0: i32, %arg1: i32, %arg2: memref<8x32xf32, #tpu.memory_space<vmem>>, %arg3: memref<32x128xbf16, #tpu.memory_space<vmem>>, %arg4: memref<8x4xf32, #tpu.memory_space<vmem>>, %arg5: memref<4x128xf32, #tpu.memory_space<vmem>>, %arg6: memref<8x128xf32, #tpu.memory_space<vmem>>) attributes {dimension_semantics = [#tpu.dimension_semantics<parallel>, #tpu.dimension_semantics<parallel>], iteration_bounds = array<i64: 2, 1>, scalar_prefetch = 0 : i64, scratch_operands = 0 : i64, tpu.core_type = #tpu.core_type<tc>, window_params = [{transform_indices = @transform_0, window_bounds = array<i64: 8, 32>}, {transform_indices = @transform_1, window_bounds = array<i64: 32, 128>}, {transform_indices = @transform_2, window_bounds = array<i64: 8, 4>}, {transform_indices = @transform_3, window_bounds = array<i64: 4, 128>}, {transform_indices = @transform_4, window_bounds = array<i64: 8, 128>}]} {
    %c0 = arith.constant 0 : index
    %c0_0 = arith.constant 0 : index
    %0 = vector.load %arg2[%c0, %c0_0] : memref<8x32xf32, #tpu.memory_space<vmem>>, vector<8x32xf32>
    %cst = arith.constant dense<0xFF800000> : vector<8xf32>
    %1 = vector.multi_reduction <maximumf>, %0, %cst [1] : vector<8x32xf32> to vector<8xf32>
    %2 = vector.shape_cast %1 : vector<8xf32> to vector<8x1xf32>
    %3 = vector.broadcast %2 : vector<8x1xf32> to vector<8x32xf32>
    %4 = arith.subf %0, %3 : vector<8x32xf32>
    %5 = math.exp %4 : vector<8x32xf32>
    %cst_1 = arith.constant dense<0.000000e+00> : vector<8xf32>
    %6 = vector.multi_reduction <add>, %5, %cst_1 [1] : vector<8x32xf32> to vector<8xf32>
    %7 = vector.shape_cast %6 : vector<8xf32> to vector<8x1xf32>
    %8 = tpu.reciprocal %7 {approx = true} : vector<8x1xf32> -> vector<8x1xf32>
    %9 = arith.truncf %5 : vector<8x32xf32> to vector<8x32xbf16>
    %c0_2 = arith.constant 0 : index
    %c0_3 = arith.constant 0 : index
    %10 = vector.load %arg3[%c0_2, %c0_3] : memref<32x128xbf16, #tpu.memory_space<vmem>>, vector<32x128xbf16>
    %cst_4 = arith.constant dense<0.000000e+00> : vector<8x128xf32>
    %11 = tpu.matmul %9, %10, %cst_4 {dimension_numbers = #tpu.dot_dimension_numbers<[1], [0], [0], [1], [0, 0, 1, 1], [], []>} : vector<8x32xbf16>, vector<32x128xbf16>, vector<8x128xf32> -> vector<8x128xf32>
    %cst_5 = arith.constant -1.000000e+00 : f32
    %12 = vector.broadcast %cst_5 : f32 to vector<8x1xf32>
    %13 = arith.mulf %8, %12 : vector<8x1xf32>
    %c0_6 = arith.constant 0 : index
    %c0_7 = arith.constant 0 : index
    %14 = vector.load %arg4[%c0_6, %c0_7] : memref<8x4xf32, #tpu.memory_space<vmem>>, vector<8x4xf32>
    %c0_8 = arith.constant 0 : index
    %c0_9 = arith.constant 0 : index
    %15 = vector.load %arg5[%c0_8, %c0_9] : memref<4x128xf32, #tpu.memory_space<vmem>>, vector<4x128xf32>
    %16 = vector.extract_strided_slice %14 {offsets = [0, 0], sizes = [8, 1], strides = [1, 1]} : vector<8x4xf32> to vector<8x1xf32>
    %17 = vector.extract_strided_slice %14 {offsets = [0, 1], sizes = [8, 1], strides = [1, 1]} : vector<8x4xf32> to vector<8x1xf32>
    %18 = vector.extract_strided_slice %14 {offsets = [0, 2], sizes = [8, 1], strides = [1, 1]} : vector<8x4xf32> to vector<8x1xf32>
    %19 = vector.extract_strided_slice %14 {offsets = [0, 3], sizes = [8, 1], strides = [1, 1]} : vector<8x4xf32> to vector<8x1xf32>
    %20 = vector.extract_strided_slice %15 {offsets = [0, 0], sizes = [1, 128], strides = [1, 1]} : vector<4x128xf32> to vector<1x128xf32>
    %21 = vector.extract_strided_slice %15 {offsets = [1, 0], sizes = [1, 128], strides = [1, 1]} : vector<4x128xf32> to vector<1x128xf32>
    %22 = vector.extract_strided_slice %15 {offsets = [2, 0], sizes = [1, 128], strides = [1, 1]} : vector<4x128xf32> to vector<1x128xf32>
    %23 = vector.extract_strided_slice %15 {offsets = [3, 0], sizes = [1, 128], strides = [1, 1]} : vector<4x128xf32> to vector<1x128xf32>
    %24 = vector.broadcast %16 : vector<8x1xf32> to vector<8x128xf32>
    %25 = vector.broadcast %20 : vector<1x128xf32> to vector<8x128xf32>
    %26 = arith.subf %24, %25 : vector<8x128xf32>
    %27 = math.absf %26 : vector<8x128xf32>
    %28 = vector.broadcast %17 : vector<8x1xf32> to vector<8x128xf32>
    %29 = vector.broadcast %21 : vector<1x128xf32> to vector<8x128xf32>
    %30 = arith.subf %28, %29 : vector<8x128xf32>
    %31 = math.absf %30 : vector<8x128xf32>
    %32 = arith.addf %27, %31 : vector<8x128xf32>
    %33 = vector.broadcast %18 : vector<8x1xf32> to vector<8x128xf32>
    %34 = vector.broadcast %22 : vector<1x128xf32> to vector<8x128xf32>
    %35 = arith.subf %33, %34 : vector<8x128xf32>
    %36 = math.absf %35 : vector<8x128xf32>
    %37 = arith.addf %32, %36 : vector<8x128xf32>
    %38 = vector.broadcast %19 : vector<8x1xf32> to vector<8x128xf32>
    %39 = vector.broadcast %23 : vector<1x128xf32> to vector<8x128xf32>
    %40 = arith.subf %38, %39 : vector<8x128xf32>
    %41 = math.absf %40 : vector<8x128xf32>
    %42 = arith.addf %37, %41 : vector<8x128xf32>
    %cst_10 = arith.constant 5.000000e-01 : f32
    %43 = vector.broadcast %cst_10 : f32 to vector<8x1xf32>
    %44 = arith.mulf %43, %18 : vector<8x1xf32>
    %45 = arith.subf %16, %44 : vector<8x1xf32>
    %cst_11 = arith.constant 5.000000e-01 : f32
    %46 = vector.broadcast %cst_11 : f32 to vector<8x1xf32>
    %47 = arith.mulf %46, %19 : vector<8x1xf32>
    %48 = arith.subf %17, %47 : vector<8x1xf32>
    %cst_12 = arith.constant 5.000000e-01 : f32
    %49 = vector.broadcast %cst_12 : f32 to vector<8x1xf32>
    %50 = arith.mulf %49, %18 : vector<8x1xf32>
    %51 = arith.addf %16, %50 : vector<8x1xf32>
    %cst_13 = arith.constant 5.000000e-01 : f32
    %52 = vector.broadcast %cst_13 : f32 to vector<8x1xf32>
    %53 = arith.mulf %52, %19 : vector<8x1xf32>
    %54 = arith.addf %17, %53 : vector<8x1xf32>
    %cst_14 = arith.constant 5.000000e-01 : f32
    %55 = vector.broadcast %cst_14 : f32 to vector<1x128xf32>
    %56 = arith.mulf %55, %22 : vector<1x128xf32>
    %57 = arith.subf %20, %56 : vector<1x128xf32>
    %cst_15 = arith.constant 5.000000e-01 : f32
    %58 = vector.broadcast %cst_15 : f32 to vector<1x128xf32>
    %59 = arith.mulf %58, %23 : vector<1x128xf32>
    %60 = arith.subf %21, %59 : vector<1x128xf32>
    %cst_16 = arith.constant 5.000000e-01 : f32
    %61 = vector.broadcast %cst_16 : f32 to vector<1x128xf32>
    %62 = arith.mulf %61, %22 : vector<1x128xf32>
    %63 = arith.addf %20, %62 : vector<1x128xf32>
    %cst_17 = arith.constant 5.000000e-01 : f32
    %64 = vector.broadcast %cst_17 : f32 to vector<1x128xf32>
    %65 = arith.mulf %64, %23 : vector<1x128xf32>
    %66 = arith.addf %21, %65 : vector<1x128xf32>
    %67 = arith.mulf %18, %19 : vector<8x1xf32>
    %68 = arith.mulf %22, %23 : vector<1x128xf32>
    %69 = vector.broadcast %45 : vector<8x1xf32> to vector<8x128xf32>
    %70 = vector.broadcast %57 : vector<1x128xf32> to vector<8x128xf32>
    %71 = arith.maximumf %69, %70 : vector<8x128xf32>
    %72 = vector.broadcast %48 : vector<8x1xf32> to vector<8x128xf32>
    %73 = vector.broadcast %60 : vector<1x128xf32> to vector<8x128xf32>
    %74 = arith.maximumf %72, %73 : vector<8x128xf32>
    %75 = vector.broadcast %51 : vector<8x1xf32> to vector<8x128xf32>
    %76 = vector.broadcast %63 : vector<1x128xf32> to vector<8x128xf32>
    %77 = arith.minimumf %75, %76 : vector<8x128xf32>
    %78 = vector.broadcast %54 : vector<8x1xf32> to vector<8x128xf32>
    %79 = vector.broadcast %66 : vector<1x128xf32> to vector<8x128xf32>
    %80 = arith.minimumf %78, %79 : vector<8x128xf32>
    %81 = arith.subf %77, %71 : vector<8x128xf32>
    %cst_18 = arith.constant 0.000000e+00 : f32
    %82 = vector.broadcast %cst_18 : f32 to vector<8x128xf32>
    %83 = arith.maximumf %81, %82 : vector<8x128xf32>
    %84 = arith.subf %80, %74 : vector<8x128xf32>
    %cst_19 = arith.constant 0.000000e+00 : f32
    %85 = vector.broadcast %cst_19 : f32 to vector<8x128xf32>
    %86 = arith.maximumf %84, %85 : vector<8x128xf32>
    %87 = arith.mulf %83, %86 : vector<8x128xf32>
    %88 = vector.broadcast %67 : vector<8x1xf32> to vector<8x128xf32>
    %89 = vector.broadcast %68 : vector<1x128xf32> to vector<8x128xf32>
    %90 = arith.addf %88, %89 : vector<8x128xf32>
    %91 = arith.subf %90, %87 : vector<8x128xf32>
    %92 = tpu.reciprocal %91 {approx = true} : vector<8x128xf32> -> vector<8x128xf32>
    %93 = arith.mulf %87, %92 : vector<8x128xf32>
    %94 = vector.broadcast %45 : vector<8x1xf32> to vector<8x128xf32>
    %95 = vector.broadcast %57 : vector<1x128xf32> to vector<8x128xf32>
    %96 = arith.minimumf %94, %95 : vector<8x128xf32>
    %97 = vector.broadcast %48 : vector<8x1xf32> to vector<8x128xf32>
    %98 = vector.broadcast %60 : vector<1x128xf32> to vector<8x128xf32>
    %99 = arith.minimumf %97, %98 : vector<8x128xf32>
    %100 = vector.broadcast %51 : vector<8x1xf32> to vector<8x128xf32>
    %101 = vector.broadcast %63 : vector<1x128xf32> to vector<8x128xf32>
    %102 = arith.maximumf %100, %101 : vector<8x128xf32>
    %103 = vector.broadcast %54 : vector<8x1xf32> to vector<8x128xf32>
    %104 = vector.broadcast %66 : vector<1x128xf32> to vector<8x128xf32>
    %105 = arith.maximumf %103, %104 : vector<8x128xf32>
    %106 = arith.subf %102, %96 : vector<8x128xf32>
    %107 = arith.subf %105, %99 : vector<8x128xf32>
    %108 = arith.mulf %106, %107 : vector<8x128xf32>
    %109 = arith.subf %108, %91 : vector<8x128xf32>
    %110 = tpu.reciprocal %108 {approx = true} : vector<8x128xf32> -> vector<8x128xf32>
    %111 = arith.mulf %109, %110 : vector<8x128xf32>
    %112 = arith.subf %111, %93 : vector<8x128xf32>
    %113 = vector.broadcast %13 : vector<8x1xf32> to vector<8x128xf32>
    %114 = arith.mulf %11, %113 : vector<8x128xf32>
    %115 = arith.addf %114, %42 : vector<8x128xf32>
    %116 = arith.addf %115, %112 : vector<8x128xf32>
    %c0_20 = arith.constant 0 : index
    %c0_21 = arith.constant 0 : index
    %117 = vector.load %arg6[%c0_20, %c0_21] : memref<8x128xf32, #tpu.memory_space<vmem>>, vector<8x128xf32>
    tpu.vector_store %arg6[%c0_20, %c0_21], %116 {strides = array<i32>} : memref<8x128xf32, #tpu.memory_space<vmem>>, vector<8x128xf32>,
    return
  }
  func.func @transform_0(%arg0: i32, %arg1: i32) -> (i32, i32) {
    %c0_i32 = arith.constant 0 : i32
    %c0_i32_0 = arith.constant 0 : i32
    return %arg0, %c0_i32 : i32, i32
  }
  func.func @transform_1(%arg0: i32, %arg1: i32) -> (i32, i32) {
    %c0_i32 = arith.constant 0 : i32
    %c0_i32_0 = arith.constant 0 : i32
    return %c0_i32, %arg1 : i32, i32
  }
  func.func @transform_2(%arg0: i32, %arg1: i32) -> (i32, i32) {
    %c0_i32 = arith.constant 0 : i32
    %c0_i32_0 = arith.constant 0 : i32
    return %arg0, %c0_i32 : i32, i32
  }
  func.func @transform_3(%arg0: i32, %arg1: i32) -> (i32, i32) {
    %c0_i32 = arith.constant 0 : i32
    %c0_i32_0 = arith.constant 0 : i32
    return %c0_i32, %arg1 : i32, i32
  }
  func.func @transform_4(%arg0: i32, %arg1: i32) -> (i32, i32) {
    %c0_i32 = arith.constant 0 : i32
    return %arg0, %arg1 : i32, i32
  }
}

</mosaic_0001>

<bundles_post_ra>
// kernel: tpu_custom_call.1
= control target key start
LH: loop header
LB: loop body
LE: loop exit
PB: predicated region body
PF: predicated region fallthrough
CT: control target
= control target key end

     0   :  { %s1345_s0 = inlined_call_operand.hbm [shape: f32[16,32], index: 0, kind: input, shape index: {}]   ;;  %s1346_s1 = inlined_call_operand.hbm [shape: bf16[32,128], index: 1, kind: input, shape index: {}]   ;;  %s1347_s2 = inlined_call_operand.hbm [shape: f32[16,4], index: 2, kind: input, shape index: {}]   ;;  %s1348_s3 = inlined_call_operand.hbm [shape: f32[4,128], index: 3, kind: input, shape index: {}]   ;;  %s1349_s4 = inlined_call_operand.hbm [shape: f32[16,128], index: 4, kind: output, shape index: {}]  }
   0x1   :  { %1360 = sst [smem:[#allocation18_spill]] %s1346_s1 }
   0x2   :  { %9 = vsyncpa [#allocation3], 0 }
   0x3   :  { %11 = vsyncpa [#allocation3 + $0x1], 0 }
   0x4   :  { %12 = vsyncpa [#allocation6], 0 }
   0x5   :  { %13 = vsyncpa [#allocation4], 0 }
   0x6   :  { %15 = vsyncpa [#allocation4 + $0x1], 0  ;;  %s1054_s15 = smov 0   ;;  %s1056_s16 = smov 0  }
   0x7   :  { %s1058_s17 = smov 0   ;;  %s1060_s18 = smov 0  }
   0x8   :  { %s1062_s19 = smov 0   ;;  %s1064_s20 = smov 0  }
   0x9 LB: > { %1361 = sst [smem:[#allocation15_spill]] %s1008_s19  ;;  %s1085_s21 = sadd.s32 4294967295, %s1012_s20   ;;  %s1012_s20 = sphi %s1064_s20, %s21_s20   ;;  %s1008_s19 = sphi %s1062_s19, %s1389_s19   ;;  %s1004_s18 = sphi %s1060_s18, %s1388_s18   ;;  %s1000_s17 = sphi %s1058_s17, %s1392_s17   ;;  %s996_s16 = sphi %s1056_s16, %s1391_s16   ;;  %s992_s15 = sphi %s1054_s15, %s1390_s15  }
   0xa   : > { %s652_s22 = sadd.s32 4294967294, %s1012_s20   ;;  %p53_p0 = scmp.ne.s32.totalorder %s996_s16, %s992_s15 }
   0xb   : > { %p1350_p1 = scmp.eq.s32.totalorder %s1085_s21, 0  ;;  %p163_p3 = scmp.eq.s32.totalorder %s652_s22, 1 }
   0xc   : > { %p653_p5 = scmp.ge.s32.totalorder %s1012_s20, 1  ;;  %p170_p7 = scmp.lt.s32.totalorder %s1012_s20, 3 }
   0xd   : > { %p1094_p4 = por %p1350_p1, %p53_p0  ;;  %p1099_p6 = por %p163_p3, %p53_p0 }
   0xe   : > { %p1104_p8 = pnand %p653_p5, %p170_p7  ;;  %s1014_s26 = smov [#allocation5]  }
   0xf   : > { %s1362_s23 = scalar_select %p1094_p4, 1, 0 }
  0x10   : > { %s1363_s24 = scalar_select %p1099_p6, 1, 0 }
  0x11   : > { %s1364_s25 = scalar_select %p1104_p8, 1, 0 }
  0x12   : > { %s184_s27 = sshll.u32 %s1014_s26, 4  ;;  %p699_p9 = pneg %p1104_p8  ;;  %s185_s27 = int_to_ptr.vmem [resolvable:$true] %s184_s27 }
  0x13   : > { %s33_s29 = sadd.s32 1, %s1008_s19  ;;  %s1366_s1 = sld [smem:[#allocation18_spill]] }
  0x14   : > { %p1113_p11 = pnand %p699_p9, %p1350_p1 }
  0x16   : > { %p1355_p13 = pneg %p1113_p11 }
  0x19   : > { %s802_s6 = scalar_lea.hbm %s1366_s1, 256 }
  0x1a   : > { %p803_p12 = scmp.ne.s32.totalorder %s1366_s1, %s802_s6  ;;  %p809_p5 = scmp.lt.u32.totalorder %s802_s6, %s1366_s1 }
  0x1c   : > { %p805_p0 = pnand %p1355_p13, %p803_p12 }
  0x1e   : > { %p806_p3 = pneg %p805_p0 }
  0x20   : > { %p811_p7 = pnand %p809_p5, %p806_p3 }
  0x22   : > { %814 = shalt.err (!%p811_p7)
}
  0x23   : > { %s815_s11 = scalar_lea.vmem %s185_s27, 256  ;;  %p823_p2 = scmp.lt.s32.totalorder %s185_s27, %s185_s27 }
  0x24   : > { %p816_p9 = scmp.ne.s32.totalorder %s185_s27, %s815_s11  ;;  %p824_p6 = scmp.lt.s32.totalorder %s815_s11, %s815_s11 }
  0x26   : > { %p818_p10 = pnand %p816_p9, %p1355_p13  ;;  %p825_p4 = por %p824_p6, %p823_p2 }
  0x28   : > { %p819_p1 = pneg %p818_p10 }
  0x2a   : > { %p826_p8 = pnand %p825_p4, %p819_p1 }
  0x2c   : > { %829 = shalt.err (!%p826_p8)
}
  0x2d   : > { %s1015_s12 = smov 64   ;;  %s1016_s13 = smov 4  }
  0x2e   : > { %702 = dma.hbm_to_vmem [thread:$0]  (!%p1113_p11), %s1366_s1, 256, %s185_s27, [#allocation6], %s1015_s12, %s1015_s12, %s1016_s13  }
  0x2f   : > { %p35_p1 = scmp.ge.s32.totalorder %s33_s29, 2  ;;  %s40_s26 = sadd.s32 1, %s1000_s17 }
  0x30   : > { %p47_p2 = scmp.ne.s32.totalorder %s1000_s17, %s996_s16  ;;  %p48_p4 = scmp.eq.s32.totalorder %s1012_s20, 0 }
  0x31   : > { %s1394_s29 = smov (%p35_p1, %s33_s29), 0  ;;  %p1369_p8 = scmp.eq.s32.totalorder %s1085_s21, 1 }
  0x32   : > { %1367 = sst [smem:[#allocation16_spill]] %s1394_s29  ;;  %p1146_p6 = por %p48_p4, %p47_p2 }
  0x33   : > { %p1152_p10 = por %p1369_p8, %p47_p2  ;;  %s37_s6 = ssub.s32 %s1008_s19, %s1394_s29 }
  0x34   : > { %p719_p12 = scmp.lt.s32.totalorder %s1012_s20, 2  ;;  %p38_p0 = scmp.eq.s32.totalorder %s37_s6, 0 }
  0x35   : > { %s1370_s5 = scalar_select %p1152_p10, 1, 0 }
  0x36   : > { %s211_s27 = sand.u32 1, %s1012_s20   ;;  %s213_s7 = sand.u32 1, %s1000_s17  }
  0x37   : > { %s1162_s8 = scalar_select %p38_p0, %s1000_s17, %s40_s26  }
  0x38   : > { %s1164_s9 = sshll.u32 %s213_s7, 3  ;;  %s658_s10 = sshll.u32 %s1008_s19, 7 }
  0x39   : > { %1371 = sst [smem:[#allocation17_spill]] %s1162_s8  ;;  %s1170_s13 = scalar_lea.hbm %s1345_s0, %s658_s10 }
  0x3a   : > { %s215_s14 = scalar_lea.vmem [#allocation2], %s1164_s9  ;;  %p1175_p3 = pnand %p719_p12, %p1146_p6 }
  0x3b   : > { %s222_s22 = sshll.u32 %s215_s14, 4  ;;  %s1184_s11 = scalar_lea.hbm %s1347_s2, %s658_s10  ;;  %s1179_s22 = int_to_ptr.vmem [resolvable:$true] %s222_s22 }
  0x3c   : > { %s1372_s6 = scalar_select %p1175_p3, 1, 0 }
  0x3d   : > { %s1186_s12 = scalar_lea.sflag [#allocation3], %s211_s27  ;;  %s830_s1 = scalar_lea.hbm %s1170_s13, 128 }
  0x3e   : > { %p831_p5 = scmp.ne.s32.totalorder %s1170_s13, %s830_s1  ;;  %p1357_p7 = pneg %p1175_p3 }
  0x3f   : > { %s835_s29 = scalar_lea.hbm %s1345_s0, 256  ;;  %p836_p2 = scmp.lt.u32.totalorder %s1170_s13, %s1345_s0 }
  0x40   : > { %p833_p9 = pnand %p1357_p7, %p831_p5  ;;  %p837_p4 = scmp.lt.u32.totalorder %s835_s29, %s830_s1 }
  0x41   : > { %p839_p8 = scmp.lt.u32.totalorder %s830_s1, %s1170_s13 }
  0x42   : > { %p834_p1 = pneg %p833_p9  ;;  %p838_p6 = por %p837_p4, %p836_p2 }
  0x44   : > { %p840_p12 = por %p839_p8, %p838_p6 }
  0x46   : > { %p841_p0 = pnand %p840_p12, %p834_p1 }
  0x48   : > { %844 = shalt.err (!%p841_p0)
}
  0x49   : > { %s845_s27 = scalar_lea.vmem %s1179_s22, 128  ;;  %s1017_s10 = smov [#allocation2]  }
  0x4a   : > { %p846_p5 = scmp.ne.s32.totalorder %s1179_s22, %s845_s27  ;;  %s850_s26 = sshll.u32 %s1017_s10, 4  ;;  %s851_s26 = int_to_ptr.vmem [resolvable:$false] %s850_s26 }
  0x4b   : > { %s852_s19 = scalar_lea.vmem %s851_s26, 256  ;;  %p853_p10 = scmp.lt.s32.totalorder %s1179_s22, %s851_s26 }
  0x4c   : > { %p848_p9 = pnand %p846_p5, %p1357_p7  ;;  %p854_p2 = scmp.lt.s32.totalorder %s852_s19, %s845_s27 }
  0x4e   : > { %p849_p13 = pneg %p848_p9  ;;  %p855_p4 = por %p854_p2, %p853_p10 }
  0x50   : > { %p856_p6 = pnand %p855_p4, %p849_p13 }
  0x52   : > { %859 = shalt.err (!%p856_p6)
}
  0x53   : > { %709 = dma.hbm_to_vmem [thread:$0]  (!%p1175_p3), %s1170_s13, 128, %s1179_s22, %s1186_s12  }
  0x54   : > { %s233_s1 = scalar_lea.vmem [#allocation7], %s1164_s9  ;;  %s1018_s8 = smov [#allocation8]  }
  0x55   : > { %s240_s29 = sshll.u32 %s233_s1, 4  ;;  %s200_s7 = sshll.u32 %s1018_s8, 4  ;;  %s1215_s29 = int_to_ptr.vmem [resolvable:$true] %s240_s29  ;;  %s201_s7 = int_to_ptr.vmem [resolvable:$true] %s200_s7 }
  0x56   : > { %s860_s27 = scalar_lea.hbm %s1348_s3, 64  ;;  %p1373_p10 = pneg %p1113_p11 }
  0x57   : > { %p861_p13 = scmp.ne.s32.totalorder %s1348_s3, %s860_s27  ;;  %p867_p12 = scmp.lt.u32.totalorder %s860_s27, %s1348_s3 }
  0x59   : > { %p863_p1 = pnand %p861_p13, %p1373_p10 }
  0x5b   : > { %p864_p8 = pneg %p863_p1 }
  0x5d   : > { %p869_p0 = pnand %p867_p12, %p864_p8 }
  0x5f   : > { %872 = shalt.err (!%p869_p0)
}
  0x60   : > { %s873_s22 = scalar_lea.vmem %s201_s7, 64  ;;  %p1374_p9 = pmov %p1373_p10 }
  0x61   : > { %p874_p5 = scmp.ne.s32.totalorder %s201_s7, %s873_s22  ;;  %p881_p6 = scmp.lt.s32.totalorder %s201_s7, %s201_s7 }
  0x62   : > { %p882_p7 = scmp.lt.s32.totalorder %s873_s22, %s873_s22 }
  0x63   : > { %p876_p2 = pnand %p874_p5, %p1374_p9 }
  0x64   : > { %p883_p3 = por %p882_p7, %p881_p6 }
  0x65   : > { %p877_p4 = pneg %p876_p2 }
  0x67   : > { %p884_p10 = pnand %p883_p3, %p877_p4 }
  0x69   : > { %887 = shalt.err (!%p884_p10)
}
  0x6a   : > { %705 = dma.hbm_to_vmem [thread:$0]  (!%p1113_p11), %s1348_s3, 64, %s201_s7, [#allocation6]  }
  0x6b   : > { %s888_s8 = scalar_lea.hbm %s1184_s11, 128  ;;  %p1375_p1 = scmp.ne.s32.totalorder %s1372_s6, 0 }
  0x6c   : > { %p889_p13 = scmp.ne.s32.totalorder %s1184_s11, %s888_s8  ;;  %s893_s27 = scalar_lea.hbm %s1347_s2, 256 }
  0x6d   : > { %p1376_p8 = pneg %p1375_p1  ;;  %p894_p3 = scmp.lt.u32.totalorder %s1184_s11, %s1347_s2 }
  0x6e   : > { %p895_p7 = scmp.lt.u32.totalorder %s893_s27, %s888_s8  ;;  %p897_p9 = scmp.lt.u32.totalorder %s888_s8, %s1184_s11 }
  0x6f   : > { %p891_p12 = pnand %p889_p13, %p1376_p8 }
  0x70   : > { %p896_p5 = por %p895_p7, %p894_p3 }
  0x71   : > { %p892_p0 = pneg %p891_p12 }
  0x72   : > { %p898_p2 = por %p897_p9, %p896_p5 }
  0x74   : > { %p899_p4 = pnand %p898_p2, %p892_p0 }
  0x76   : > { %902 = shalt.err (!%p899_p4)
}
  0x77   : > { %s903_s7 = scalar_lea.vmem %s1215_s29, 128  ;;  %p1377_p6 = pmov %p1376_p8 }
  0x78   : > { %p904_p11 = scmp.ne.s32.totalorder %s1215_s29, %s903_s7  ;;  %s1019_s26 = smov [#allocation7]  }
  0x79   : > { %s908_s13 = sshll.u32 %s1019_s26, 4  ;;  %s909_s13 = int_to_ptr.vmem [resolvable:$false] %s908_s13 }
  0x7a   : > { %p906_p10 = pnand %p904_p11, %p1377_p6  ;;  %s910_s9 = scalar_lea.vmem %s909_s13, 256 }
  0x7b   : > { %p911_p8 = scmp.lt.s32.totalorder %s1215_s29, %s909_s13  ;;  %p912_p12 = scmp.lt.s32.totalorder %s910_s9, %s903_s7 }
  0x7c   : > { %p907_p13 = pneg %p906_p10 }
  0x7d   : > { %p913_p3 = por %p912_p12, %p911_p8 }
  0x7f   : > { %p914_p7 = pnand %p913_p3, %p907_p13 }
  0x81   : > { %917 = shalt.err (!%p914_p7)
}
  0x82   : > { %712 = dma.hbm_to_vmem [thread:$0]  (!%p1375_p1), %s1184_s11, 128, %s1215_s29, %s1186_s12  }
  0x83   : > { %p1378_p0 = scmp.ne.s32.totalorder %s1364_s25, 0 }
  0x84   : > { %s251_s22 = sand.u32 (!%p1378_p0), 1, %s1085_s21   ;;  %s253_s19 = sand.u32 (!%p1378_p0), 1, %s996_s16  }
  0x85   : > { %249 = sbr.rel (%p1378_p0) target bundleno = 543 (0x21f), region = 36  ;;  %s1267_s1 = sshll.u32 (!%p1378_p0), %s253_s19, 3 }
  0x86   : > { %s252_s8 = scalar_lea.sflag (!%p1378_p0), [#allocation3], %s251_s22  ;;  %s255_s30 = scalar_lea.vmem (!%p1378_p0), [#allocation2], %s1267_s1 }
  0x87   : > { %p1379_p5 = scmp.ne.s32.totalorder (!%p1378_p0), %s1362_s23, 0 }
  0x8c   : > { %971 = dma.done.wait (%p1379_p5), %s252_s8, 128  }
  0x8d   : > { %973 = vsyncadd (%p1379_p5), %s252_s8, 4294967168  ;;  %p1380_p1 = scmp.eq.s32.totalorder %s1085_s21, 0 }
  0x8f   : > { %975 = dma.done.wait (%p1380_p1), [#allocation6], 256   ;;  %p1381_p9 = pmov %p1380_p1 }
  0x90   : > { %s268_s25 = scalar_lea.vmem [#allocation7], %s1267_s1 }
  0x91   : > { %977 = vsyncadd (%p1381_p9), [#allocation6], 4294967040 }
  0x92   : > { %979 = dma.done.wait (%p1379_p5), %s252_s8, 128  }
  0x93   : > { %981 = vsyncadd (%p1379_p5), %s252_s8, 4294967168  ;;  %p1382_p2 = pmov %p1380_p1 }
  0x94   : > { %p1383_p4 = pmov %p1380_p1 }
  0x95   : > { %983 = dma.done.wait (%p1382_p2), [#allocation6], 64  }
  0x96   : > { %985 = vsyncadd (%p1383_p4), [#allocation6], 4294967232  ;;  %vm304_vm0 = vcmask 261120   ;;  %v303_v0 = vld [vmem:[%s255_s30] sm:$0xff]  ;;  %s1020_s6 = smov 127   ;;  %v1021_v4 = vmov 0   ;;  %v383_v24 = vlaneseq }
  0x97   : > { %v376_v1 = vld [vmem:[%s268_s25] sm:$0xff]  ;;  %v305_v2 = vsel %vm304_vm0, %v303_v0, -inf  ;;  %786 = vset.pattern.permute.xlu1 %v1021_v4  ;;  %783 = vset.pattern.permute.xlu0 %v1021_v4  ;;  %v792_v5 = vld [vmem:[#allocation5] sm:$0xff]   ;;  %v1022_v6 = vmov 0.0   ;;  %s1023_s23 = smov 126   ;;  %v793_v7 = vld [vmem:[#allocation5 + $0x8] sm:$0xff]  }
  0x98   : > { %435 = vrot.lane.b32.xlu1 %v376_v1, %s1020_s6  ;;  %306 = vmax.xlane.f32.xlu0 %v305_v2  ;;  %v422_v3 = vmul.f32 0.5, %v376_v1  ;;  %vm1024_vm1 = vmmov 0   ;;  %v1025_v8 = vmov 2   ;;  %v1026_v11 = vmov 1   ;;  %v377_v23 = vld [vmem:[#allocation8] sm:$0xf] }
  0x99   : > { %677 = vmatprep.subr.bf16.mxu0 %v1022_v6  ;;  %681 = vmatprep.mubr.msk.bf16.mxu0 %vm1024_vm1, %v1022_v6  ;;  %v1027_v20 = vmov 3   ;;  %v429_v25 = vmul.f32 0.5, %v377_v23  ;;  %v384_v27 = vshrl.u32 %v383_v24, 7  ;;  %v440_v39 = vrot.slane %v377_v23, 1  ;;  %s671_s21 = sshll.u32 %s1004_s18, 7  ;;  %s301_s11 = scalar_lea.vmem [#allocation9], %s1267_s1 }
  0x9a   : > { %678 = vmatpush3.bf16.msra.mxu0 %v792_v5  ;;  %s529_s12 = sshll.u32 %s301_s11, 4  ;;  %s1295_s27 = scalar_lea.hbm %s1349_s4, %s671_s21  ;;  %s1297_s12 = int_to_ptr.vmem [resolvable:$true] %s529_s12 }
  0x9b   : > { %679 = vmatprep.subr.bf16.mxu0 %v1022_v6  ;;  %v431_v28 = vrot.slane %v429_v25, 2  ;;  %v385_v30 = vsub.s32 0, %v384_v27  ;;  %v395_v32 = vsub.s32 1, %v384_v27  ;;  %v406_v47 = vsub.s32 2, %v384_v27  ;;  %s515_s28 = scalar_lea.sflag [#allocation4], %s253_s19  ;;  %s918_s18 = scalar_lea.vmem %s1297_s12, 128 }
  0x9c   : > { %v442_v48 = vmul.f32 %v440_v39, %v377_v23  ;;  %v417_v6 = vsub.s32 3, %v384_v27  ;;  %p919_p11 = scmp.ne.s32.totalorder %s1297_s12, %s918_s18  ;;  %p1384_p6 = scmp.ne.s32.totalorder %s1370_s5, 0 }
  0x9d   : > { %v433_v31 = vsub.f32 %v377_v23, %v431_v28  ;;  %v434_v33 = vadd.f32 %v431_v28, %v377_v23  ;;  %v386_v61 = vrot.slane %v377_v23, %v385_v30  ;;  %v407_v5 = vrot.slane %v377_v23, %v406_v47  ;;  %s1028_s10 = smov [#allocation9]  }
  0x9e   : > { %680 = vmatpush3.bf16.msra.mxu0 %v793_v7  ;;  %v494_v51 = vrot.slane %v442_v48, %v406_v47  ;;  %p920_p10 = pnand %p919_p11, %p1384_p6  ;;  %s922_s7 = sshll.u32 %s1028_s10, 4  ;;  %s923_s7 = int_to_ptr.vmem [resolvable:$false] %s922_s7 }
  0x9f   : > { %v451_v34 = vrot.slane %v433_v31, %v385_v30  ;;  %v460_v35 = vrot.slane %v433_v31, %v395_v32  ;;  %v470_v36 = vrot.slane %v434_v33, %v385_v30  ;;  %v479_v37 = vrot.slane %v434_v33, %v395_v32  ;;  %s924_s26 = scalar_lea.vmem %s923_s7, 256  ;;  %p925_p8 = scmp.lt.s32.totalorder %s1297_s12, %s923_s7 }
  0xa0   : > { %p921_p13 = pneg %p920_p10  ;;  %p926_p12 = scmp.lt.s32.totalorder %s924_s26, %s918_s18 }
  0xa2   : > { %p927_p3 = por %p926_p12, %p925_p8 }
  0xa4   : > { %p928_p7 = pnand %p927_p3, %p921_p13 }
  0xae   : > { %424 = vrot.lane.b32.xlu0 %v422_v3, %s1023_s23 }
  0xb2   : > { %380 = vperm.xlu0 %783, %v376_v1  }
  0xb6   : > { %784 = vset.pattern.permute.xlu0 %v1025_v8 }
 0x10a   : > { %v436_v9 = vpop.permute.xlu1 %435 }
 0x10b   : > { %v438_v10 = vmul.f32 %v436_v9, %v376_v1 }
 0x10d   : > { %488 = vperm.xlu0 %784, %v438_v10  }
 0x111   : > { %785 = vset.pattern.permute.xlu0 %v1026_v11 }
 0x112   : > { %390 = vperm.xlu0 %785, %v376_v1  }
 0x116   : > { %790 = vset.pattern.permute.xlu0 %v1025_v8 }
 0x117   : > { %401 = vperm.xlu0 %790, %v376_v1  }
 0x125   : > { %v307_v12 = vpop.xlane.xlu0 %306 }
 0x126   : > { %v308_v13 = vsub.f32 %v303_v0, %v307_v12  ;;  %v396_v0 = vrot.slane %v377_v23, %v395_v32 }
 0x128   : > { %v309_v14 = vmul.f32 1.442695, %v308_v13 }
 0x129   : > { %v425_v15 = vpop.permute.xlu0 %424 }
 0x12a   : > { %794 = vpow2.f32 %v309_v14  ;;  %v427_v16 = vsub.f32 %v376_v1, %v425_v15  ;;  %v428_v17 = vadd.f32 %v425_v15, %v376_v1 }
 0x12c   : > { %445 = vperm.xlu1 %786, %v427_v16  }
 0x130   : > { %787 = vset.pattern.permute.xlu1 %v1026_v11 }
 0x131   : > { %454 = vperm.xlu1 %787, %v427_v16   ;;  %v381_v44 = vpop.permute.xlu0 %380 }
 0x132   : > { %v387_v3 = vsub.f32 %v381_v44, %v386_v61 }
 0x134   : > { %v795_v18 = vpop.eup %794  ;;  %v388_v8 = vand.u32 2147483647, %v387_v3 }
 0x135   : > { %788 = vset.pattern.permute.xlu1 %v1021_v4  ;;  %v315_v19 = vpack.c.bf16 %v795_v18, %v795_v18  ;;  %v311_v21 = vsel %vm304_vm0, %v795_v18, 0.0 }
 0x136   : > { %464 = vperm.xlu1 %788, %v428_v17  }
 0x137   : > { %682 = vmatmul.mubr.msk.bf16.vlgmr.msra.gmra.mrb[0].mxu0 %vm304_vm0, %v315_v19 }
 0x13a   : > { %789 = vset.pattern.permute.xlu1 %v1026_v11  ;;  %v418_v11 = vrot.slane %v377_v23, %v417_v6 }
 0x13b   : > { %473 = vperm.xlu1 %789, %v428_v17  }
 0x13f   : > { %791 = vset.pattern.permute.xlu1 %v1027_v20 }
 0x15f   : > { %312 = vadd.xlane.f32.xlu1 %v311_v21 }
 0x170   : > { %412 = vperm.xlu1 %791, %v376_v1  }
 0x18c   : > { %v489_v52 = vpop.permute.xlu0 %488 }
 0x18d   : > { %v495_v58 = vadd.f32 %v494_v51, %v489_v52 }
 0x191   : > { %v391_v62 = vpop.permute.xlu0 %390 }
 0x192   : > { %v397_v4 = vsub.f32 %v391_v62, %v396_v0 }
 0x194   : > { %v398_v9 = vand.u32 2147483647, %v397_v4 }
 0x196   : > { %v402_v7 = vpop.permute.xlu0 %401  ;;  %v399_v13 = vadd.f32 %v398_v9, %v388_v8 }
 0x197   : > { %v408_v10 = vsub.f32 %v402_v7, %v407_v5 }
 0x199   : > { %v409_v14 = vand.u32 2147483647, %v408_v10 }
 0x19b   : > { %v410_v18 = vadd.f32 %v409_v14, %v399_v13 }
 0x1ab   : > { %v446_v22 = vpop.permute.xlu1 %445 }
 0x1ac   : > { %v452_v40 = vmax.f32 %v446_v22, %v451_v34  ;;  %v499_v53 = vmin.f32 %v446_v22, %v451_v34 }
 0x1b0   : > { %v455_v26 = vpop.permute.xlu1 %454 }
 0x1b1   : > { %v461_v41 = vmax.f32 %v455_v26, %v460_v35  ;;  %v500_v54 = vmin.f32 %v455_v26, %v460_v35 }
 0x1b5   : > { %v465_v29 = vpop.permute.xlu1 %464 }
 0x1b6   : > { %v471_v42 = vmin.f32 %v465_v29, %v470_v36  ;;  %v501_v55 = vmax.f32 %v465_v29, %v470_v36 }
 0x1b8   : > { %v481_v45 = vsub.f32 %v471_v42, %v452_v40  ;;  %v503_v59 = vsub.f32 %v501_v55, %v499_v53 }
 0x1ba   : > { %v474_v38 = vpop.permute.xlu1 %473  ;;  %v482_v49 = vmax.f32 %v481_v45, 0.0 }
 0x1bb   : > { %v480_v43 = vmin.f32 %v474_v38, %v479_v37  ;;  %v502_v56 = vmax.f32 %v474_v38, %v479_v37 }
 0x1bd   : > { %v483_v46 = vsub.f32 %v480_v43, %v461_v41  ;;  %v504_v60 = vsub.f32 %v502_v56, %v500_v54 }
 0x1bf   : > { %v484_v50 = vmax.f32 %v483_v46, 0.0  ;;  %v505_v2 = vmul.f32 %v504_v60, %v503_v59 }
 0x1c1   : > { %v485_v57 = vmul.f32 %v484_v50, %v482_v49 }
 0x1c3   : > { %v496_v63 = vsub.f32 %v495_v58, %v485_v57 }
 0x1c5   : > { %796 = vrcp.f32 %v496_v63  ;;  %v506_v22 = vsub.f32 %v505_v2, %v496_v63 }
 0x1cf   : > { %v797_v16 = vpop.eup %796 }
 0x1d0   : > { %v498_v21 = vmul.f32 %v797_v16, %v485_v57 }
 0x1ec   : > { %v313_v1 = vpop.xlane.xlu1 %312 }
 0x1ed   : > { %798 = vrcp.f32 %v313_v1 }
 0x1ee   : > { %800 = vrcp.f32 %v505_v2 }
 0x1f0   : > { %v413_v12 = vpop.permute.xlu1 %412 }
 0x1f1   : > { %v419_v15 = vsub.f32 %v413_v12, %v418_v11 }
 0x1f3   : > { %v420_v19 = vand.u32 2147483647, %v419_v15 }
 0x1f5   : > { %v421_v27 = vadd.f32 %v420_v19, %v410_v18 }
 0x1f7   : > { %v799_v17 = vpop.eup %798 }
 0x1f8   : > { %v801_v20 = vpop.eup %800  ;;  %v375_v24 = vmul.f32 -1.0, %v799_v17 }
 0x1f9   : > { %v508_v26 = vmul.f32 %v801_v20, %v506_v22 }
 0x1fb   : > { %v509_v30 = vsub.f32 %v508_v26, %v498_v21 }
 0x20a   : > { %v369_v25 = vpop.f32.mrb[0].mxu0 }
 0x20b   : > { %v510_v28 = vmul.f32 %v375_v24, %v369_v25  ;;  %v683_v23 = vpop.f32.mrb[1].mxu0 }
 0x20c   : > { %v372_v29 = vpop.f32.mrb[2].mxu0 }
 0x20d   : > { %v511_v31 = vadd.f32 %v510_v28, %v421_v27  ;;  %v684_v32 = vpop.f32.mrb[3].mxu0 }
 0x20f   : > { %v512_v33 = vadd.f32 %v511_v31, %v509_v30 }
 0x211   : > { %513 = vst [vmem:[%s301_s11] sm:$0xff] %v512_v33 }
 0x212   : > { %931 = shalt.err (!%p928_p7)
}
 0x213   : > { %s932_s13 = scalar_lea.hbm %s1295_s27, 128  ;;  %s936_s19 = scalar_lea.hbm %s1349_s4, 256 }
 0x214   : > { %p933_p0 = scmp.ne.s32.totalorder %s1295_s27, %s932_s13  ;;  %p937_p9 = scmp.lt.u32.totalorder %s1295_s27, %s1349_s4 }
 0x215   : > { %p938_p2 = scmp.lt.u32.totalorder %s936_s19, %s932_s13  ;;  %p940_p11 = scmp.lt.u32.totalorder %s932_s13, %s1295_s27 }
 0x216   : > { %p934_p5 = pnand %p933_p0, %p1384_p6 }
 0x217   : > { %p939_p4 = por %p938_p2, %p937_p9 }
 0x218   : > { %p935_p1 = pneg %p934_p5 }
 0x219   : > { %p941_p10 = por %p940_p11, %p939_p4 }
 0x21b   : > { %p942_p13 = pnand %p941_p10, %p935_p1 }
 0x21d   : > { %945 = shalt.err (!%p942_p13)
}
 0x21e   : > { %697 = dma.vmem_to_hbm [thread:$0]  (%p1384_p6), %s1297_s12, 128, %s1295_s27, %s515_s28  }
 0x21f PF: > { %s541_s30 = sand.u32 1, %s992_s15   ;;  %p1385_p8 = scmp.ne.s32.totalorder %s1363_s24, 0 }
 0x220   : > { %p1386_p12 = scmp.ge.s32.totalorder %s1012_s20, 2  ;;  %s542_s25 = scalar_lea.sflag [#allocation4], %s541_s30 }
 0x222   : > { %p714_p3 = pnand %p1386_p12, %p1385_p8 }
 0x224   : > { %987 = dma.done.wait (!%p714_p3), %s542_s25, 128  }
 0x225   : > { %989 = vsyncadd (!%p714_p3), %s542_s25, 4294967168  ;;  %s21_s20 = sadd.s32 1, %s1012_s20   ;;  %s1387_s5 = sld [smem:[#allocation17_spill]] }
 0x226   : > { %p18_p7 = scmp.ge.s32.totalorder %s21_s20, 4   ;;  %s1388_s18 = sld [smem:[#allocation15_spill]] }
 0x227   : > { %s1389_s19 = sld [smem:[#allocation16_spill]]  ;;  %s1390_s15 = smov %s996_s16 }
 0x228   : > { %s1391_s16 = smov %s1000_s17  ;;  %20 = sbr.rel (!%p18_p7) target bundleno = 9 (0x9), region = 102 }
 0x22b   : > { %s1392_s17 = smov %s1387_s5 }
 0x22f   :  { %547 = vsyncpa [#allocation3], 1 }
 0x230   :  { %549 = vsyncpa [#allocation3 + $0x1], 1 }
 0x231   :  { %550 = vsyncpa [#allocation6], 1 }
 0x232   :  { %551 = vsyncpa [#allocation4], 1 }
 0x233   :  { %553 = vsyncpa [#allocation4 + $0x1], 1 }

</bundles_post_ra>
